<compile_context>
chip_gen: v7x
topology: tpu7x:2x2x1
jax: 0.10.0
libtpu: 0.0.40
codegen_flags: <defaults>
</compile_context>

<pallas_src>
import functools

import jax
import jax.numpy as jnp
from jax.experimental import pallas as pl
from jax.experimental.pallas import tpu as pltpu

context_size = 32
embedding_dim = 64


def head_kernel(x_ref, w_ref, o_ref, *, scale, head_size):
    # x_ref: (B, T, C) bf16, w_ref: (C, 3H) bf16, o_ref: (B, T, H) f32
    B, T, C = x_ref.shape
    H = head_size

    # One fused projection matmul over all B*T tokens (bf16 in, f32 acc).
    x2d = x_ref[...].reshape(B * T, C)                        # (B*T, C) bf16
    kqv = jnp.dot(x2d, w_ref[...],
                  preferred_element_type=jnp.float32)         # (B*T, 3H) f32
    kqv = kqv.reshape(B, T, 3 * H)
    keys = kqv[:, :, 0:H]                                     # (B, T, H) f32
    queries = kqv[:, :, H:2 * H]
    values = kqv[:, :, 2 * H:3 * H]

    # Fold 1/sqrt(C) into keys (small tensor), then back to bf16 for the MXU.
    k_s = (keys * scale).astype(jnp.bfloat16)
    q_b = queries.astype(jnp.bfloat16)

    # einsum('bkx,bqx->bkq'): batched dot_general contracting the last axes
    # of keys / queries -- no transpose is materialized.
    att = jnp.einsum("bkh,bqh->bkq", k_s, q_b,
                     preferred_element_type=jnp.float32)      # (B, T, T) f32

    # Causal (tril) mask generated in-kernel: masked where q > k.
    row = jax.lax.broadcasted_iota(jnp.int32, (T, T), 0)
    col = jax.lax.broadcasted_iota(jnp.int32, (T, T), 1)
    att = jnp.where((col > row)[None, :, :], -jnp.inf, att)

    # Softmax over the last axis, kept in f32 (EUP exp + approx reciprocal).
    m = jnp.max(att, axis=-1, keepdims=True)
    e = jnp.exp(att - m)
    denom = jnp.sum(e, axis=-1, keepdims=True)
    p = e * pl.reciprocal(denom, approx=True)

    # einsum('BTC,BCE->BTE'): attention @ values, bf16 operands, f32 acc.
    out = jnp.einsum("bkq,bqh->bkh",
                     p.astype(jnp.bfloat16),
                     values.astype(jnp.bfloat16),
                     preferred_element_type=jnp.float32)      # (B, T, H) f32
    o_ref[...] = out


def head_forward(x, wk, wq, wv):
    B, T, C = x.shape
    H = wk.shape[1]
    scale = 1.0 / (C ** 0.5)     # PyTorch divides by x.shape[2] ** 0.5

    # Fuse the three projections into a single (C, 3H) weight and move the
    # matmul operands to bf16 up front (halves HBM->VMEM traffic).
    w_kqv = jnp.concatenate([wk, wq, wv], axis=1).astype(jnp.bfloat16)
    x_bf = x.astype(jnp.bfloat16)

    kernel = functools.partial(head_kernel, scale=scale, head_size=H)
    return pl.pallas_call(
        kernel,
        out_shape=jax.ShapeDtypeStruct((B, T, H), jnp.float32),
        # No grid: the whole problem fits comfortably in VMEM on every
        # generation (even v7x's 64 MiB), so one invocation does it all.
        in_specs=[
            pl.BlockSpec(memory_space=pltpu.MemorySpace.VMEM),  # x (B, T, C)
            pl.BlockSpec(memory_space=pltpu.MemorySpace.VMEM),  # W_kqv (C, 3H)
        ],
        out_specs=pl.BlockSpec(memory_space=pltpu.MemorySpace.VMEM),
    )(x_bf, w_kqv)


def head_reference(x, wk, wq, wv):
    """Pure-JAX f32 reference matching the PyTorch module exactly."""
    T = x.shape[1]
    keys = x @ wk
    queries = x @ wq
    values = x @ wv
    att = jnp.einsum("bkx,bqx->bkq", keys, queries) / (x.shape[2] ** 0.5)
    mask = jnp.tril(jnp.ones((T, T), dtype=jnp.float32))
    att = jnp.where(mask == 0.0, -jnp.inf, att)
    att = jax.nn.softmax(att, axis=-1)
    return jnp.einsum("BTC,BCE->BTE", att, values)


if __name__ == "__main__":
    B = 2
    T = context_size      # mask is (context_size, context_size), so T must match
    C = embedding_dim
    H = 16                # head_size

    key = jax.random.PRNGKey(0)
    kx, kk, kq, kv = jax.random.split(key, 4)

    x = jax.random.normal(kx, (B, T, C), dtype=jnp.float32)
    # nn.Linear(embedding_dim, head_size, bias=False) weights, stored as (C, H)
    wk = jax.random.normal(kk, (C, H), dtype=jnp.float32) * (1.0 / C ** 0.5)
    wq = jax.random.normal(kq, (C, H), dtype=jnp.float32) * (1.0 / C ** 0.5)
    wv = jax.random.normal(kv, (C, H), dtype=jnp.float32) * (1.0 / C ** 0.5)

    out = head_forward(x, wk, wq, wv)
    jax.block_until_ready(out)

    assert out.shape == (B, T, H)
    # Loose tolerance: kernel uses bf16 matmul operands (f32 accumulation).
    ref = head_reference(x, wk, wq, wv)
    max_err = float(jnp.max(jnp.abs(out - ref)))
    assert jnp.allclose(out, ref, atol=2e-1, rtol=2e-1), max_err
    print("KERNEL_OK")
</pallas_src>

<mosaic_0001>
module attributes {stable_mosaic.version = 11 : i64} {
  func.func @head_kernel(%arg0: memref<2x32x64xbf16, #tpu.memory_space<vmem>>, %arg1: memref<64x48xbf16, #tpu.memory_space<vmem>>, %arg2: memref<2x32x16xf32, #tpu.memory_space<vmem>>) attributes {dimension_semantics = [], scalar_prefetch = 0 : i64, scratch_operands = 0 : i64, tpu.core_type = #tpu.core_type<tc>} {
    %c0 = arith.constant 0 : index
    %c0_0 = arith.constant 0 : index
    %c0_1 = arith.constant 0 : index
    %0 = vector.load %arg0[%c0, %c0_0, %c0_1] : memref<2x32x64xbf16, #tpu.memory_space<vmem>>, vector<2x32x64xbf16>
    %1 = vector.shape_cast %0 : vector<2x32x64xbf16> to vector<64x64xbf16>
    %c0_2 = arith.constant 0 : index
    %c0_3 = arith.constant 0 : index
    %2 = vector.load %arg1[%c0_2, %c0_3] : memref<64x48xbf16, #tpu.memory_space<vmem>>, vector<64x48xbf16>
    %cst = arith.constant dense<0.000000e+00> : vector<64x48xf32>
    %3 = tpu.matmul %1, %2, %cst {dimension_numbers = #tpu.dot_dimension_numbers<[1], [0], [0], [1], [0, 0, 1, 1], [], []>} : vector<64x64xbf16>, vector<64x48xbf16>, vector<64x48xf32> -> vector<64x48xf32>
    %4 = vector.shape_cast %3 : vector<64x48xf32> to vector<2x32x48xf32>
    %5 = vector.extract_strided_slice %4 {offsets = [0, 0, 0], sizes = [2, 32, 16], strides = [1, 1, 1]} : vector<2x32x48xf32> to vector<2x32x16xf32>
    %6 = vector.extract_strided_slice %4 {offsets = [0, 0, 16], sizes = [2, 32, 16], strides = [1, 1, 1]} : vector<2x32x48xf32> to vector<2x32x16xf32>
    %7 = vector.extract_strided_slice %4 {offsets = [0, 0, 32], sizes = [2, 32, 16], strides = [1, 1, 1]} : vector<2x32x48xf32> to vector<2x32x16xf32>
    %cst_4 = arith.constant 1.250000e-01 : f32
    %8 = vector.broadcast %cst_4 : f32 to vector<2x32x16xf32>
    %9 = arith.mulf %5, %8 : vector<2x32x16xf32>
    %10 = arith.truncf %9 : vector<2x32x16xf32> to vector<2x32x16xbf16>
    %11 = arith.truncf %6 : vector<2x32x16xf32> to vector<2x32x16xbf16>
    "tpu.trace_start"() <{level = 10 : i32, message = "bkh,bqh->bkq"}> : () -> ()
    %cst_5 = arith.constant dense<0.000000e+00> : vector<2x32x32xf32>
    %12 = tpu.matmul %10, %11, %cst_5 {dimension_numbers = #tpu.dot_dimension_numbers<[2], [2], [1], [1], [0, 0, 0, 1, 1, 1], [0], [0]>} : vector<2x32x16xbf16>, vector<2x32x16xbf16>, vector<2x32x32xf32> -> vector<2x32x32xf32>
    "tpu.trace_stop"() : () -> ()
    %13 = tpu.iota {dimensions = array<i32: 0>} : vector<32x32xi32>
    %14 = tpu.iota {dimensions = array<i32: 1>} : vector<32x32xi32>
    %15 = arith.cmpi sgt, %14, %13 : vector<32x32xi32>
    %16 = vector.shape_cast %15 : vector<32x32xi1> to vector<1x32x32xi1>
    %cst_6 = arith.constant 0xFF800000 : f32
    %17 = vector.shape_cast %16 : vector<1x32x32xi1> to vector<1x32x32xi1>
    %18 = vector.broadcast %17 : vector<1x32x32xi1> to vector<2x32x32xi1>
    %19 = vector.broadcast %cst_6 : f32 to vector<2x32x32xf32>
    %20 = arith.select %18, %19, %12 : vector<2x32x32xi1>, vector<2x32x32xf32>
    %cst_7 = arith.constant dense<0xFF800000> : vector<2x32xf32>
    %21 = vector.multi_reduction <maximumf>, %20, %cst_7 [2] : vector<2x32x32xf32> to vector<2x32xf32>
    %22 = vector.shape_cast %21 : vector<2x32xf32> to vector<2x32x1xf32>
    %23 = vector.broadcast %22 : vector<2x32x1xf32> to vector<2x32x32xf32>
    %24 = arith.subf %20, %23 : vector<2x32x32xf32>
    %25 = math.exp %24 : vector<2x32x32xf32>
    %cst_8 = arith.constant dense<0.000000e+00> : vector<2x32xf32>
    %26 = vector.multi_reduction <add>, %25, %cst_8 [2] : vector<2x32x32xf32> to vector<2x32xf32>
    %27 = vector.shape_cast %26 : vector<2x32xf32> to vector<2x32x1xf32>
    %28 = tpu.reciprocal %27 {approx = true} : vector<2x32x1xf32> -> vector<2x32x1xf32>
    %29 = vector.broadcast %28 : vector<2x32x1xf32> to vector<2x32x32xf32>
    %30 = arith.mulf %25, %29 : vector<2x32x32xf32>
    %31 = arith.truncf %30 : vector<2x32x32xf32> to vector<2x32x32xbf16>
    %32 = arith.truncf %7 : vector<2x32x16xf32> to vector<2x32x16xbf16>
    "tpu.trace_start"() <{level = 10 : i32, message = "bkq,bqh->bkh"}> : () -> ()
    %cst_9 = arith.constant dense<0.000000e+00> : vector<2x32x16xf32>
    %33 = tpu.matmul %31, %32, %cst_9 {dimension_numbers = #tpu.dot_dimension_numbers<[2], [1], [1], [2], [0, 0, 0, 1, 1, 2], [0], [0]>} : vector<2x32x32xbf16>, vector<2x32x16xbf16>, vector<2x32x16xf32> -> vector<2x32x16xf32>
    "tpu.trace_stop"() : () -> ()
    %c0_10 = arith.constant 0 : index
    %c0_11 = arith.constant 0 : index
    %c0_12 = arith.constant 0 : index
    %34 = vector.load %arg2[%c0_10, %c0_11, %c0_12] : memref<2x32x16xf32, #tpu.memory_space<vmem>>, vector<2x32x16xf32>
    tpu.vector_store %arg2[%c0_10, %c0_11, %c0_12], %33 {strides = array<i32>} : memref<2x32x16xf32, #tpu.memory_space<vmem>>, vector<2x32x16xf32>,
    return
  }
}

</mosaic_0001>

<bundles_post_ra>
// kernel: tpu_custom_call.1
= control target key start
LH: loop header
LB: loop body
LE: loop exit
PB: predicated region body
PF: predicated region fallthrough
CT: control target
= control target key end

     0   :  { %vm72_vm0 = vcmask 523264   ;;  %vm172_vm1 = vcmask 130048   ;;  %v301_v40 = vlaneseq  ;;  %vm328_vm3 = vcmask 261120   ;;  %s826_s1 = inlined_call_operand.vmem [shape: bf16[64,48], index: 1, kind: input, shape index: {}]   ;;  %s827_s0 = inlined_call_operand.vmem [shape: bf16[2,32,64], index: 0, kind: input, shape index: {}]   ;;  %s828_s2 = inlined_call_operand.vmem [shape: f32[2,32,16], index: 2, kind: output, shape index: {}]  }
   0x1   :  { %v653_v0 = vld [vmem:[%s826_s1] sm:$0xff]   ;;  %v654_v1 = vld [vmem:[%s826_s1 + $0x8] sm:$0xff]   ;;  %v655_v2 = vld [vmem:[%s826_s1 + $0x10] sm:$0xff]  }
   0x2   :  { %599 = vmatprep.subr.bf16.mxu0 %v653_v0  ;;  %v657_v3 = vld [vmem:[%s827_s0] sm:$0xff]   ;;  %v656_v4 = vld [vmem:[%s826_s1 + $0x18] sm:$0xff]   ;;  %v658_v5 = vld [vmem:[%s827_s0 + $0x8] sm:$0xff]   ;;  %s693_s1 = smov 112   ;;  %v302_v41 = vshrl.u32 %v301_v40, 7  ;;  %v307_v42 = vand.u32 127, %v301_v40 }
   0x3   :  { %600 = vmatpush3.bf16.msra.mxu0 %v653_v0  ;;  %607 = vmatprep.mubr.msk.bf16.mxu0 %vm72_vm0, %v657_v3  ;;  %v659_v6 = vld [vmem:[%s827_s0 + $0x10] sm:$0xff]   ;;  %v660_v7 = vld [vmem:[%s827_s0 + $0x18] sm:$0xff]   ;;  %s694_s0 = smov 96  }
   0x4   :  { %601 = vmatprep.subr.bf16.mxu0 %v654_v1  ;;  %v304_v43 = vadd.s32 16, %v302_v41  ;;  %v303_v44 = vadd.s32 8, %v302_v41  ;;  %vm308_vm2 = vcmp.gt.s32.totalorder %v307_v42, %v302_v41  ;;  %v305_v47 = vadd.s32 24, %v302_v41 }
   0x6   :  { %vm310_vm4 = vcmp.gt.s32.totalorder %v307_v42, %v304_v43  ;;  %vm309_vm5 = vcmp.gt.s32.totalorder %v307_v42, %v303_v44  ;;  %vm311_vm6 = vcmp.gt.s32.totalorder %v307_v42, %v305_v47 }
   0x7   :  { %602 = vmatpush3.bf16.msra.mxu0 %v654_v1 }
   0x8   :  { %603 = vmatprep.subr.bf16.mxu0 %v655_v2 }
   0xb   :  { %604 = vmatpush3.bf16.msra.mxu0 %v655_v2 }
   0xc   :  { %605 = vmatprep.subr.bf16.mxu0 %v656_v4 }
   0xf   :  { %606 = vmatpush3.bf16.msra.mxu0 %v656_v4 }
  0x12   :  { %608 = vmatmul.mubr.msk.bf16.vlgmr.msra.gmra.mrb[0].mxu0 %vm72_vm0, %v658_v5 }
  0x13   :  { %611 = vmatprep.mubr.msk.bf16.mxu0 %vm72_vm0, %v659_v6 }
  0x1a   :  { %612 = vmatmul.mubr.msk.bf16.gmra.mrb[4].mxu0 %vm72_vm0, %v660_v7 }
  0xe5   :  { %v609_v8 = vpop.f32.mrb[0].mxu0 }
  0xe6   :  { %v119_v9 = vpop.f32.mrb[1].mxu0  ;;  %v152_v11 = vmul.f32 0.125, %v609_v8 }
  0xe7   :  { %v610_v10 = vpop.f32.mrb[2].mxu0  ;;  %v150_v15 = vmul.f32 0.125, %v119_v9 }
  0xe8   :  { %v153_v12 = vmul.f32 0.125, %v610_v10  ;;  %v734_v13 = vpack.c.bf16 %v610_v10, %v609_v8  ;;  %v122_v14 = vpop.f32.mrb[3].mxu0 }
  0xe9   :  { %v151_v16 = vmul.f32 0.125, %v122_v14  ;;  %v736_v17 = vpack.c.bf16 %v122_v14, %v119_v9 }
  0xea   :  { %v159_v18 = vpack.c.bf16 %v153_v12, %v152_v11 }
  0xeb   :  { %168 = vrot.lane.b32.xlu0 %v736_v17, %s693_s1  ;;  %v158_v19 = vpack.c.bf16 %v151_v16, %v150_v15 }
  0xed   :  { %v613_v20 = vpop.f32.mrb[4].mxu0  ;;  %619 = vmatprep.mubr.msk.bf16.mxu1 %vm172_vm1, %v158_v19 }
  0xee   :  { %v156_v21 = vmul.f32 0.125, %v613_v20  ;;  %v135_v22 = vpop.f32.mrb[5].mxu0 }
  0xef   :  { %v154_v23 = vmul.f32 0.125, %v135_v22  ;;  %170 = vrot.lane.b32.xlu0 %v734_v13, %s693_s1  ;;  %v614_v24 = vpop.f32.mrb[6].mxu0 }
  0xf0   :  { %v157_v25 = vmul.f32 0.125, %v614_v24  ;;  %v741_v26 = vpack.c.bf16 %v614_v24, %v613_v20  ;;  %v138_v27 = vpop.f32.mrb[7].mxu0 }
  0xf1   :  { %v155_v28 = vmul.f32 0.125, %v138_v27  ;;  %v743_v29 = vpack.c.bf16 %v138_v27, %v135_v22 }
  0xf2   :  { %v161_v30 = vpack.c.bf16 %v157_v25, %v156_v21 }
  0xf3   :  { %v160_v31 = vpack.c.bf16 %v155_v28, %v154_v23  ;;  %236 = vrot.lane.b32.xlu1 %v743_v29, %s693_s1 }
  0xf5   :  { %627 = vmatprep.mubr.msk.bf16.mxu0 %vm172_vm1, %v160_v31 }
  0xf7   :  { %238 = vrot.lane.b32.xlu1 %v741_v26, %s693_s1 }
 0x15d   :  { %v169_v32 = vpop.permute.xlu0 %168 }
 0x15e   :  { %647 = vmatprep.subr.msk.bf16.mxu1 %vm172_vm1, %v169_v32  ;;  %v180_v33 = vsel %vm172_vm1, %v169_v32, 0 }
 0x15f   :  { %616 = vmatpush3.bf16.xpose.msra.mxu1 %v180_v33 }
 0x161   :  { %v171_v34 = vpop.permute.xlu0 %170 }
 0x162   :  { %648 = vmatprep.subr.msk.bf16.mxu1 %vm172_vm1, %v171_v34  ;;  %v183_v37 = vsel %vm172_vm1, %v171_v34, 0 }
 0x165   :  { %v237_v35 = vpop.permute.xlu1 %236 }
 0x166   :  { %v247_v36 = vsel %vm172_vm1, %v237_v35, 0  ;;  %649 = vmatprep.subr.msk.bf16.mxu0 %vm172_vm1, %v237_v35 }
 0x167   :  { %618 = vmatpush3.bf16.xpose.msra.mxu1 %v183_v37  ;;  %624 = vmatpush3.bf16.xpose.msra.mxu0 %v247_v36 }
 0x169   :  { %v239_v38 = vpop.permute.xlu1 %238 }
 0x16a   :  { %650 = vmatprep.subr.msk.bf16.mxu0 %vm172_vm1, %v239_v38  ;;  %v250_v39 = vsel %vm172_vm1, %v239_v38, 0 }
 0x16e   :  { %620 = vmatmul.mubr.msk.bf16.vlgmr.msra.gmra.mrb[0].mxu1 %vm172_vm1, %v159_v18 }
 0x16f   :  { %626 = vmatpush3.bf16.xpose.msra.mxu0 %v250_v39 }
 0x176   :  { %628 = vmatmul.mubr.msk.bf16.vlgmr.msra.gmra.mrb[8].mxu0 %vm172_vm1, %v161_v30 }
 0x241   :  { %v621_v45 = vpop.f32.mrb[0].mxu1 }
 0x242   :  { %v219_v46 = vpop.f32.mrb[1].mxu1  ;;  %v322_v52 = vsel %vm310_vm4, -inf, %v621_v45 }
 0x243   :  { %v320_v48 = vsel %vm308_vm2, -inf, %v219_v46  ;;  %v622_v49 = vpop.f32.mrb[2].mxu1  ;;  %v335_v55 = vsel %vm328_vm3, %v322_v52, -inf }
 0x244   :  { %v222_v50 = vpop.f32.mrb[3].mxu1  ;;  %v329_v51 = vsel %vm328_vm3, %v320_v48, -inf  ;;  %v323_v56 = vsel %vm311_vm6, -inf, %v622_v49 }
 0x245   :  { %v321_v53 = vsel %vm309_vm5, -inf, %v222_v50  ;;  %330 = vmax.xlane.f32.xlu0 %v329_v51  ;;  %v338_v62 = vsel %vm328_vm3, %v323_v56, -inf }
 0x246   :  { %v332_v54 = vsel %vm328_vm3, %v321_v53, -inf }
 0x247   :  { %333 = vmax.xlane.f32.xlu1 %v332_v54 }
 0x249   :  { %336 = vmax.xlane.f32.xlu0 %v335_v55  ;;  %v629_v57 = vpop.f32.mrb[8].mxu0 }
 0x24a   :  { %v286_v58 = vpop.f32.mrb[9].mxu0  ;;  %v326_v0 = vsel %vm310_vm4, -inf, %v629_v57 }
 0x24b   :  { %v324_v59 = vsel %vm308_vm2, -inf, %v286_v58  ;;  %v630_v60 = vpop.f32.mrb[10].mxu0  ;;  %v347_v2 = vsel %vm328_vm3, %v326_v0, -inf }
 0x24c   :  { %v289_v61 = vpop.f32.mrb[11].mxu0  ;;  %v341_v63 = vsel %vm328_vm3, %v324_v59, -inf  ;;  %v327_v4 = vsel %vm311_vm6, -inf, %v630_v60 }
 0x24d   :  { %v325_v1 = vsel %vm309_vm5, -inf, %v289_v61  ;;  %339 = vmax.xlane.f32.xlu0 %v338_v62  ;;  %342 = vmax.xlane.f32.xlu1 %v341_v63  ;;  %v350_v5 = vsel %vm328_vm3, %v327_v4, -inf }
 0x24e   :  { %v344_v3 = vsel %vm328_vm3, %v325_v1, -inf }
 0x251   :  { %348 = vmax.xlane.f32.xlu1 %v347_v2  ;;  %345 = vmax.xlane.f32.xlu0 %v344_v3 }
 0x255   :  { %351 = vmax.xlane.f32.xlu0 %v350_v5 }
 0x262   :  { %421 = vrot.lane.b32.xlu1 %v736_v17, %s694_s0 }
 0x2d2   :  { %v331_v6 = vpop.xlane.xlu0 %330 }
 0x2d3   :  { %v353_v7 = vsub.f32 %v320_v48, %v331_v6 }
 0x2d4   :  { %v334_v8 = vpop.xlane.xlu1 %333 }
 0x2d5   :  { %v361_v11 = vmul.f32 1.442695, %v353_v7  ;;  %v354_v12 = vsub.f32 %v321_v53, %v334_v8 }
 0x2d6   :  { %v337_v9 = vpop.xlane.xlu0 %336 }
 0x2d7   :  { %v355_v10 = vsub.f32 %v322_v52, %v337_v9  ;;  %v363_v19 = vmul.f32 1.442695, %v354_v12 }
 0x2d9   :  { %v365_v14 = vmul.f32 1.442695, %v355_v10 }
 0x2da   :  { %v340_v15 = vpop.xlane.xlu0 %339  ;;  %v343_v16 = vpop.xlane.xlu1 %342 }
 0x2db   :  { %661 = vpow2.f32 %v365_v14  ;;  %v356_v18 = vsub.f32 %v323_v56, %v340_v15  ;;  %v357_v21 = vsub.f32 %v324_v59, %v343_v16 }
 0x2dc   :  { %663 = vpow2.f32 %v361_v11 }
 0x2dd   :  { %v367_v20 = vmul.f32 1.442695, %v356_v18  ;;  %v369_v24 = vmul.f32 1.442695, %v357_v21 }
 0x2de   :  { %v349_v22 = vpop.xlane.xlu1 %348  ;;  %v346_v23 = vpop.xlane.xlu0 %345 }
 0x2df   :  { %665 = vpow2.f32 %v367_v20  ;;  %v359_v17 = vsub.f32 %v326_v0, %v349_v22  ;;  %v358_v27 = vsub.f32 %v325_v1, %v346_v23 }
 0x2e0   :  { %667 = vpow2.f32 %v363_v19 }
 0x2e1   :  { %v373_v25 = vmul.f32 1.442695, %v359_v17  ;;  %v371_v33 = vmul.f32 1.442695, %v358_v27 }
 0x2e2   :  { %v422_v28 = vpop.permute.xlu1 %421  ;;  %v352_v30 = vpop.xlane.xlu0 %351 }
 0x2e3   :  { %669 = vpow2.f32 %v373_v25  ;;  %v360_v31 = vsub.f32 %v327_v4, %v352_v30  ;;  %631 = vmatprep.subr.bf16.mxu1 %v422_v28 }
 0x2e4   :  { %632 = vmatpush3.bf16.msra.mxu1 %v422_v28  ;;  %671 = vpow2.f32 %v369_v24 }
 0x2e5   :  { %v662_v32 = vpop.eup %661  ;;  %v375_v34 = vmul.f32 1.442695, %v360_v31 }
 0x2e6   :  { %v383_v35 = vsel %vm328_vm3, %v662_v32, 0.0  ;;  %v664_v36 = vpop.eup %663 }
 0x2e7   :  { %673 = vpow2.f32 %v375_v34  ;;  %384 = vadd.xlane.f32.xlu1 %v383_v35  ;;  %v377_v38 = vsel %vm328_vm3, %v664_v36, 0.0 }
 0x2e8   :  { %675 = vpow2.f32 %v371_v33 }
 0x2e9   :  { %v666_v37 = vpop.eup %665 }
 0x2ea   :  { %v386_v39 = vsel %vm328_vm3, %v666_v37, 0.0  ;;  %v668_v40 = vpop.eup %667 }
 0x2eb   :  { %378 = vadd.xlane.f32.xlu1 %v377_v38  ;;  %387 = vadd.xlane.f32.xlu0 %v386_v39  ;;  %v380_v43 = vsel %vm328_vm3, %v668_v40, 0.0 }
 0x2ed   :  { %v670_v41 = vpop.eup %669 }
 0x2ee   :  { %v395_v42 = vsel %vm328_vm3, %v670_v41, 0.0  ;;  %v672_v44 = vpop.eup %671 }
 0x2ef   :  { %396 = vadd.xlane.f32.xlu1 %v395_v42  ;;  %381 = vadd.xlane.f32.xlu0 %v380_v43  ;;  %v389_v46 = vsel %vm328_vm3, %v672_v44, 0.0 }
 0x2f1   :  { %v674_v45 = vpop.eup %673 }
 0x2f2   :  { %v398_v47 = vsel %vm328_vm3, %v674_v45, 0.0  ;;  %v676_v48 = vpop.eup %675 }
 0x2f3   :  { %390 = vadd.xlane.f32.xlu1 %v389_v46  ;;  %399 = vadd.xlane.f32.xlu0 %v398_v47  ;;  %v392_v49 = vsel %vm328_vm3, %v676_v48, 0.0 }
 0x2f7   :  { %393 = vadd.xlane.f32.xlu0 %v392_v49 }
 0x304   :  { %482 = vrot.lane.b32.xlu1 %v743_v29, %s694_s0 }
 0x308   :  { %484 = vrot.lane.b32.xlu1 %v741_v26, %s694_s0 }
 0x30d   :  { %423 = vrot.lane.b32.xlu0 %v734_v13, %s694_s0 }
 0x374   :  { %v385_v50 = vpop.xlane.xlu1 %384 }
 0x378   :  { %v379_v51 = vpop.xlane.xlu1 %378  ;;  %v388_v52 = vpop.xlane.xlu0 %387 }
 0x379   :  { %677 = vrcp.f32 %v388_v52 }
 0x37a   :  { %679 = vrcp.f32 %v379_v51 }
 0x37b   :  { %681 = vrcp.f32 %v385_v50 }
 0x37c   :  { %v397_v53 = vpop.xlane.xlu1 %396  ;;  %v382_v54 = vpop.xlane.xlu0 %381 }
 0x37d   :  { %683 = vrcp.f32 %v382_v54 }
 0x380   :  { %v391_v55 = vpop.xlane.xlu1 %390  ;;  %v400_v56 = vpop.xlane.xlu0 %399 }
 0x381   :  { %685 = vrcp.f32 %v391_v55 }
 0x382   :  { %687 = vrcp.f32 %v400_v56 }
 0x383   :  { %689 = vrcp.f32 %v397_v53  ;;  %v678_v57 = vpop.eup %677 }
 0x384   :  { %v394_v29 = vpop.xlane.xlu0 %393  ;;  %v680_v26 = vpop.eup %679  ;;  %v412_v59 = vmul.f32 %v678_v57, %v666_v37 }
 0x385   :  { %691 = vrcp.f32 %v394_v29  ;;  %v682_v58 = vpop.eup %681  ;;  %v483_v61 = vpop.permute.xlu1 %482  ;;  %v409_v62 = vmul.f32 %v680_v26, %v664_v36 }
 0x386   :  { %v411_v0 = vmul.f32 %v682_v58, %v662_v32 }
 0x387   :  { %v684_v13 = vpop.eup %683 }
 0x388   :  { %v424_v60 = vpop.permute.xlu0 %423  ;;  %v410_v63 = vmul.f32 %v684_v13, %v668_v40  ;;  %v418_v3 = vpack.c.bf16 %v412_v59, %v411_v0 }
 0x389   :  { %633 = vmatprep.subr.bf16.mxu1 %v424_v60  ;;  %v485_v7 = vpop.permute.xlu1 %484 }
 0x38a   :  { %634 = vmatpush3.bf16.msra.mxu1 %v424_v60  ;;  %v417_v1 = vpack.c.bf16 %v410_v63, %v409_v62 }
 0x38b   :  { %639 = vmatprep.subr.bf16.mxu1 %v483_v61  ;;  %v686_v2 = vpop.eup %685 }
 0x38c   :  { %v688_v4 = vpop.eup %687  ;;  %635 = vmatprep.mubr.msk.bf16.mxu1 %vm328_vm3, %v417_v1  ;;  %v413_v9 = vmul.f32 %v686_v2, %v672_v44 }
 0x38d   :  { %v690_v5 = vpop.eup %689  ;;  %636 = vmatmul.mubr.msk.bf16.vlgmr.msra.gmra.mrb[4].mxu1 %vm328_vm3, %v418_v3  ;;  %v416_v8 = vmul.f32 %v688_v4, %v674_v45 }
 0x38e   :  { %640 = vmatpush3.bf16.msra.mxu1 %v483_v61  ;;  %v415_v11 = vmul.f32 %v690_v5, %v670_v41 }
 0x38f   :  { %v692_v6 = vpop.eup %691  ;;  %641 = vmatprep.subr.bf16.mxu1 %v485_v7 }
 0x390   :  { %v414_v10 = vmul.f32 %v692_v6, %v676_v48  ;;  %v420_v14 = vpack.c.bf16 %v416_v8, %v415_v11 }
 0x392   :  { %v419_v12 = vpack.c.bf16 %v414_v10, %v413_v9  ;;  %642 = vmatpush3.bf16.msra.mxu1 %v485_v7 }
 0x394   :  { %643 = vmatprep.mubr.msk.bf16.mxu1 %vm328_vm3, %v419_v12 }
 0x395   :  { %644 = vmatmul.mubr.msk.bf16.vlgmr.msra.gmra.mrb[8].mxu1 %vm328_vm3, %v420_v14 }
 0x460   :  { %v637_v15 = vpop.f32.mrb[4].mxu1 }
 0x461   :  { %545 = vst.msk [vmem:[%s828_s2 + $0x10] sm:$0xff] %vm172_vm1, %v637_v15  ;;  %v467_v16 = vpop.f32.mrb[5].mxu1 }
 0x462   :  { %543 = vst.msk [vmem:[%s828_s2] sm:$0xff] %vm172_vm1, %v467_v16  ;;  %v638_v18 = vpop.f32.mrb[6].mxu1 }
 0x463   :  { %546 = vst.msk [vmem:[%s828_s2 + $0x18] sm:$0xff] %vm172_vm1, %v638_v18  ;;  %v470_v19 = vpop.f32.mrb[7].mxu1 }
 0x464   :  { %544 = vst.msk [vmem:[%s828_s2 + $0x8] sm:$0xff] %vm172_vm1, %v470_v19 }
 0x468   :  { %v645_v20 = vpop.f32.mrb[8].mxu1 }
 0x469   :  { %549 = vst.msk [vmem:[%s828_s2 + $0x30] sm:$0xff] %vm172_vm1, %v645_v20  ;;  %v528_v21 = vpop.f32.mrb[9].mxu1 }
 0x46a   :  { %547 = vst.msk [vmem:[%s828_s2 + $0x20] sm:$0xff] %vm172_vm1, %v528_v21  ;;  %v646_v22 = vpop.f32.mrb[10].mxu1 }
 0x46b   :  { %550 = vst.msk [vmem:[%s828_s2 + $0x38] sm:$0xff] %vm172_vm1, %v646_v22  ;;  %v531_v23 = vpop.f32.mrb[11].mxu1 }
 0x46c   :  { %548 = vst.msk [vmem:[%s828_s2 + $0x28] sm:$0xff] %vm172_vm1, %v531_v23 }

</bundles_post_ra>
